<compile_context>
chip_gen: v5e
topology: v5e:2x2
jax: 0.10.0
libtpu: 0.0.40
codegen_flags: <defaults>
</compile_context>

<pallas_src>
import functools

import jax
import jax.numpy as jnp
from jax.experimental import pallas as pl
from jax.experimental.pallas import tpu as pltpu

# ----- model dims (small, consistent with the module's structure) -----------
BATCH = 8          # batch of sequences
SEQ = 8            # token positions out of the (frozen) encoder
HIDDEN = 128       # bert hidden size (768 for bert-base; small here)
FC1 = 512          # self.fc1 = nn.Linear(hidden, 512)
N_CLASSES = 4      # len(class_names)
DROP_P = 0.2
KEEP_P = 1.0 - DROP_P


def _classifier_kernel(*refs, training: bool):
    if training:
        (lhs_ref, u_ref,
         wp_ref, bp_ref, w1_ref, b1_ref, w2_ref, b2_ref, out_ref) = refs
    else:
        (lhs_ref,
         wp_ref, bp_ref, w1_ref, b1_ref, w2_ref, b2_ref, out_ref) = refs
        u_ref = None

    # CLS token hidden state, cast to bf16 for the MXU (f32 accumulation).
    x = lhs_ref[:, 0, :].astype(jnp.bfloat16)                     # [B, H]

    # BERT pooler: tanh(cls @ Wp + bp)
    pooled = jnp.tanh(
        jnp.dot(x, wp_ref[...], preferred_element_type=jnp.float32)
        + bp_ref[...])                                            # [B, H] f32

    # fc1 + ReLU
    h = jnp.dot(pooled.astype(jnp.bfloat16), w1_ref[...],
                preferred_element_type=jnp.float32) + b1_ref[...]
    h = jnp.maximum(h, 0.0)                                       # [B, FC1]

    # dropout(p=0.2) — inverted dropout, training mode only.
    # (Host-generated uniforms; single compare + select per vreg.)
    if training:
        keep = u_ref[...] < KEEP_P
        h = jnp.where(keep, h * (1.0 / KEEP_P), 0.0)

    # output projection 512 -> 4 (natural shape, no lane padding in HBM)
    logits = jnp.dot(h.astype(jnp.bfloat16), w2_ref[...],
                     preferred_element_type=jnp.float32) + b2_ref[...]
    out_ref[...] = logits.astype(out_ref.dtype)


def news_classifier_head(last_hidden_state, params, *, dropout_key=None,
                         training=False):
    """Fused pooler + fc1 + relu + dropout + out.

    last_hidden_state: [B, S, H] output of the frozen BERT encoder (f32).
    """
    b, _, _ = last_hidden_state.shape
    vmem = pl.BlockSpec(memory_space=pltpu.MemorySpace.VMEM)

    args = [last_hidden_state]
    if training:
        if dropout_key is None:
            raise ValueError("training=True requires dropout_key")
        # Dropout randomness generated host-side (pltpu PRNG has no
        # interpret-mode lowering); fresh key per call => fresh mask per call.
        args.append(jax.random.uniform(dropout_key, (b, FC1), jnp.float32))
    args += [params["wp"], params["bp"],
             params["w1"], params["b1"],
             params["w2"], params["b2"]]

    flops = 2 * b * (HIDDEN * HIDDEN + HIDDEN * FC1 + FC1 * N_CLASSES)
    bytes_accessed = (sum(a.size * a.dtype.itemsize for a in args)
                      + b * N_CLASSES * 4)
    cost = pl.CostEstimate(flops=flops,
                           transcendentals=b * HIDDEN,          # tanh
                           bytes_accessed=bytes_accessed)

    return pl.pallas_call(
        functools.partial(_classifier_kernel, training=training),
        out_shape=jax.ShapeDtypeStruct((b, N_CLASSES), jnp.float32),
        in_specs=[vmem] * len(args),
        out_specs=vmem,
        cost_estimate=cost,
    )(*args)


def init_params(key):
    """Deterministic synthetic weights (shapes follow the module's __init__).

    Weights are stored [in, out] (transposed vs. nn.Linear) and in bf16;
    biases stay f32.
    """
    ks = jax.random.split(key, 6)

    def linear_w(kw, fan_in, fan_out):
        bound = 1.0 / jnp.sqrt(fan_in)
        w = jax.random.uniform(kw, (fan_in, fan_out), jnp.float32, -bound, bound)
        return w.astype(jnp.bfloat16)

    wp = linear_w(ks[0], HIDDEN, HIDDEN)                             # bert pooler
    bp = jax.random.uniform(ks[1], (1, HIDDEN), jnp.float32, -0.1, 0.1)
    w1 = linear_w(ks[2], HIDDEN, FC1)                                # fc1
    b1 = jax.random.uniform(ks[3], (1, FC1), jnp.float32, -0.1, 0.1)
    w2 = linear_w(ks[4], FC1, N_CLASSES)                             # out 512->4
    b2 = jax.random.uniform(ks[5], (1, N_CLASSES), jnp.float32, -0.1, 0.1)
    return {"wp": wp, "bp": bp, "w1": w1, "b1": b1, "w2": w2, "b2": b2}


def reference_eval(last_hidden_state, params):
    """Plain-JAX reference of the eval-mode forward (dropout = identity),
    matching the kernel's bf16-input / f32-accumulate matmuls."""
    def dot_bf16(x, w):
        return jnp.dot(x.astype(jnp.bfloat16), w,
                       preferred_element_type=jnp.float32)

    cls = last_hidden_state[:, 0, :]
    pooled = jnp.tanh(dot_bf16(cls, params["wp"]) + params["bp"])
    h = jnp.maximum(dot_bf16(pooled, params["w1"]) + params["b1"], 0.0)
    return dot_bf16(h, params["w2"]) + params["b2"]


if __name__ == "__main__":
    key = jax.random.PRNGKey(0)
    k_x, k_p, k_d = jax.random.split(key, 3)

    # synthetic encoder output (stand-in for frozen BERT last_hidden_state)
    last_hidden_state = jax.random.normal(k_x, (BATCH, SEQ, HIDDEN), jnp.float32)
    params = init_params(k_p)

    # eval-mode forward (dropout inactive) — check against reference
    logits_eval = jax.block_until_ready(
        news_classifier_head(last_hidden_state, params, training=False))
    ref = reference_eval(last_hidden_state, params)
    assert logits_eval.shape == (BATCH, N_CLASSES)
    assert jnp.allclose(logits_eval, ref, atol=1e-2, rtol=1e-2), \
        "mismatch vs reference"

    # training-mode forward (dropout active)
    logits_train = jax.block_until_ready(
        news_classifier_head(last_hidden_state, params,
                             dropout_key=k_d, training=True))
    assert logits_train.shape == (BATCH, N_CLASSES)
    assert bool(jnp.all(jnp.isfinite(logits_train)))

    print("KERNEL_OK")
</pallas_src>

<mosaic_0001>
module attributes {stable_mosaic.version = 11 : i64} {
  func.func @_classifier_kernel(%arg0: memref<8x8x128xf32, #tpu.memory_space<vmem>>, %arg1: memref<128x128xbf16, #tpu.memory_space<vmem>>, %arg2: memref<1x128xf32, #tpu.memory_space<vmem>>, %arg3: memref<128x512xbf16, #tpu.memory_space<vmem>>, %arg4: memref<1x512xf32, #tpu.memory_space<vmem>>, %arg5: memref<512x4xbf16, #tpu.memory_space<vmem>>, %arg6: memref<1x4xf32, #tpu.memory_space<vmem>>, %arg7: memref<8x4xf32, #tpu.memory_space<vmem>>) attributes {dimension_semantics = [], scalar_prefetch = 0 : i64, scratch_operands = 0 : i64, tpu.core_type = #tpu.core_type<tc>} {
    %c0 = arith.constant 0 : index
    %c0_0 = arith.constant 0 : index
    %c0_1 = arith.constant 0 : index
    %0 = vector.load %arg0[%c0, %c0_0, %c0_1] : memref<8x8x128xf32, #tpu.memory_space<vmem>>, vector<8x1x128xf32>
    %1 = vector.shape_cast %0 : vector<8x1x128xf32> to vector<8x128xf32>
    %2 = arith.truncf %1 : vector<8x128xf32> to vector<8x128xbf16>
    %c0_2 = arith.constant 0 : index
    %c0_3 = arith.constant 0 : index
    %3 = vector.load %arg1[%c0_2, %c0_3] : memref<128x128xbf16, #tpu.memory_space<vmem>>, vector<128x128xbf16>
    %cst = arith.constant dense<0.000000e+00> : vector<8x128xf32>
    %4 = tpu.matmul %2, %3, %cst {dimension_numbers = #tpu.dot_dimension_numbers<[1], [0], [0], [1], [0, 0, 1, 1], [], []>} : vector<8x128xbf16>, vector<128x128xbf16>, vector<8x128xf32> -> vector<8x128xf32>
    %c0_4 = arith.constant 0 : index
    %c0_5 = arith.constant 0 : index
    %5 = vector.load %arg2[%c0_4, %c0_5] : memref<1x128xf32, #tpu.memory_space<vmem>>, vector<1x128xf32>
    %6 = vector.broadcast %5 : vector<1x128xf32> to vector<8x128xf32>
    %7 = arith.addf %4, %6 : vector<8x128xf32>
    %8 = math.tanh %7 : vector<8x128xf32>
    %9 = arith.truncf %8 : vector<8x128xf32> to vector<8x128xbf16>
    %c0_6 = arith.constant 0 : index
    %c0_7 = arith.constant 0 : index
    %10 = vector.load %arg3[%c0_6, %c0_7] : memref<128x512xbf16, #tpu.memory_space<vmem>>, vector<128x512xbf16>
    %cst_8 = arith.constant dense<0.000000e+00> : vector<8x512xf32>
    %11 = tpu.matmul %9, %10, %cst_8 {dimension_numbers = #tpu.dot_dimension_numbers<[1], [0], [0], [1], [0, 0, 1, 1], [], []>} : vector<8x128xbf16>, vector<128x512xbf16>, vector<8x512xf32> -> vector<8x512xf32>
    %c0_9 = arith.constant 0 : index
    %c0_10 = arith.constant 0 : index
    %12 = vector.load %arg4[%c0_9, %c0_10] : memref<1x512xf32, #tpu.memory_space<vmem>>, vector<1x512xf32>
    %13 = vector.broadcast %12 : vector<1x512xf32> to vector<8x512xf32>
    %14 = arith.addf %11, %13 : vector<8x512xf32>
    %cst_11 = arith.constant 0.000000e+00 : f32
    %15 = vector.broadcast %cst_11 : f32 to vector<8x512xf32>
    %16 = arith.maximumf %14, %15 : vector<8x512xf32>
    %17 = arith.truncf %16 : vector<8x512xf32> to vector<8x512xbf16>
    %c0_12 = arith.constant 0 : index
    %c0_13 = arith.constant 0 : index
    %18 = vector.load %arg5[%c0_12, %c0_13] : memref<512x4xbf16, #tpu.memory_space<vmem>>, vector<512x4xbf16>
    %cst_14 = arith.constant dense<0.000000e+00> : vector<8x4xf32>
    %19 = tpu.matmul %17, %18, %cst_14 {dimension_numbers = #tpu.dot_dimension_numbers<[1], [0], [0], [1], [0, 0, 1, 1], [], []>} : vector<8x512xbf16>, vector<512x4xbf16>, vector<8x4xf32> -> vector<8x4xf32>
    %c0_15 = arith.constant 0 : index
    %c0_16 = arith.constant 0 : index
    %20 = vector.load %arg6[%c0_15, %c0_16] : memref<1x4xf32, #tpu.memory_space<vmem>>, vector<1x4xf32>
    %21 = vector.broadcast %20 : vector<1x4xf32> to vector<8x4xf32>
    %22 = arith.addf %19, %21 : vector<8x4xf32>
    %c0_17 = arith.constant 0 : index
    %c0_18 = arith.constant 0 : index
    %23 = vector.load %arg7[%c0_17, %c0_18] : memref<8x4xf32, #tpu.memory_space<vmem>>, vector<8x4xf32>
    tpu.vector_store %arg7[%c0_17, %c0_18], %22 {strides = array<i32>} : memref<8x4xf32, #tpu.memory_space<vmem>>, vector<8x4xf32>,
    return
  }
}

</mosaic_0001>

<bundles_post_ra>
// kernel: tpu_custom_call.1
= control target key start
LH: loop header
LB: loop body
LE: loop exit
PB: predicated region body
PF: predicated region fallthrough
CT: control target
= control target key end

     0   :  { %12 = vsyncpa [#allocation3], 0  ;;  %s1555_s0 = inlined_call_operand.hbm [shape: f32[8,8,128], index: 0, kind: input, shape index: {}]   ;;  %s1556_s1 = inlined_call_operand.hbm [shape: bf16[128,128], index: 1, kind: input, shape index: {}]   ;;  %s1557_s2 = inlined_call_operand.vmem [shape: f32[1,128], index: 2, kind: input, shape index: {}]   ;;  %s1558_s3 = inlined_call_operand.vmem [shape: bf16[128,512], index: 3, kind: input, shape index: {}]   ;;  %s1559_s4 = inlined_call_operand.vmem [shape: f32[1,512], index: 4, kind: input, shape index: {}]   ;;  %s1560_s5 = inlined_call_operand.vmem [shape: bf16[512,4], index: 5, kind: input, shape index: {}]   ;;  %s1561_s6 = inlined_call_operand.vmem [shape: f32[1,4], index: 6, kind: input, shape index: {}]   ;;  %s1562_s7 = inlined_call_operand.vmem [shape: f32[8,4], index: 7, kind: output, shape index: {}]  }
   0x1   :  { %s18_s26 = sshll.u32 %s1555_s0, 4  ;;  %s19_s26 = int_to_ptr.hbm [resolvable:$true] %s18_s26 }
   0x2   :  { %13 = vsyncpa [#allocation5], 0  ;;  %s1200_s27 = smov [#allocation2]   ;;  %s31_s8 = sshll.u32 %s1556_s1, 4  ;;  %s32_s8 = int_to_ptr.hbm [resolvable:$true] %s31_s8 }
   0x3   :  { %s20_s28 = sshll.u32 %s1200_s27, 4  ;;  %s1201_s9 = smov 128   ;;  %s21_s28 = int_to_ptr.vmem [resolvable:$true] %s20_s28 }
   0x4   :  { %s1202_s10 = smov 8   ;;  %s1203_s11 = smov [#allocation4]  }
   0x5   :  { %26 = dma.hbm_to_vmem [thread:$0]  %s19_s26, 1024, %s21_s28, [#allocation3], %s1201_s9, %s1201_s9, %s1202_s10  }
   0x6   :  { %s33_s12 = sshll.u32 %s1203_s11, 4  ;;  %s1204_s13 = smov 64   ;;  %s34_s12 = int_to_ptr.vmem [resolvable:$true] %s33_s12 }
   0x7   :  { %s1205_s14 = smov 4  }
   0x8   :  { %39 = dma.hbm_to_vmem [thread:$0]  %s32_s8, 1024, %s34_s12, [#allocation5], %s1204_s13, %s1204_s13, %s1205_s14  }
   0x9   :  { %1196 = dma.done.wait [#allocation3], 1024  }
   0xa   :  { %1197 = vsyncadd [#allocation3], 4294966272 }
   0xb   :  { %1198 = dma.done.wait [#allocation5], 1024  }
   0xc   :  { %1199 = vsyncadd [#allocation5], 4294966272  ;;  %v1073_v0 = vld [vmem:[#allocation4 + $0x38] sm:$0xff]  ;;  %v1072_v1 = vld [vmem:[#allocation4 + $0x30] sm:$0xff]  ;;  %vm111_vm0 = vcmask 1041409   ;;  %vm114_vm1 = vcmask 1042434  }
   0xd   :  { %181 = vmatpush.bf16.msra.mxu0 %v1073_v0  ;;  %v58_v2 = vld [vmem:[#allocation2] sm:$0x1]  ;;  %v59_v3 = vld [vmem:[#allocation2 + $0x8] sm:$0x1]  ;;  %v60_v4 = vld [vmem:[#allocation2 + $0x10] sm:$0x1] }
   0xe   :  { %v61_v5 = vld [vmem:[#allocation2 + $0x18] sm:$0x1]  ;;  %v66_v6 = vpack.c.bf16 %v58_v2, %v58_v2  ;;  %v62_v7 = vld [vmem:[#allocation2 + $0x20] sm:$0x1]  ;;  %v67_v8 = vpack.c.bf16 %v59_v3, %v59_v3  ;;  %v68_v9 = vpack.c.bf16 %v60_v4, %v60_v4  ;;  %v63_v11 = vld [vmem:[#allocation2 + $0x28] sm:$0x1] }
   0xf   :  { %v69_v10 = vpack.c.bf16 %v61_v5, %v61_v5  ;;  %v70_v12 = vpack.c.bf16 %v62_v7, %v62_v7  ;;  %v924_v13 = vld [vmem:[%s1558_s3 + $0xe0] sm:$0xf]  ;;  %v1104_v14 = vld [vmem:[%s1558_s3 + $0xec] sm:$0xf0]  ;;  %v1071_v15 = vld [vmem:[#allocation4 + $0x28] sm:$0xff]  ;;  %v71_v26 = vpack.c.bf16 %v63_v11, %v63_v11  ;;  %vm117_vm2 = vcmask 1043459  }
  0x10   :  { %v102_v16 = vunpack.c.l.b16 %v66_v6  ;;  %v103_v17 = vunpack.c.l.b16 %v67_v8  ;;  %v104_v18 = vunpack.c.l.b16 %v68_v9  ;;  %v1102_v20 = vld [vmem:[%s1558_s3 + $0xe4] sm:$0xf]  ;;  %v926_v21 = vld [vmem:[%s1558_s3 + $0xf0] sm:$0xf0]  ;;  %v925_v22 = vor.u32 %v1104_v14, %v924_v13  ;;  %v932_v23 = vld [vmem:[%s1558_s3 + $0xe8] sm:$0xf] }
  0x11   :  { %182 = vmatpush.bf16.msra.mxu0 %v1072_v1  ;;  %v105_v19 = vunpack.c.l.b16 %v69_v10  ;;  %v1105_v24 = vld [vmem:[%s1558_s3 + $0xf4] sm:$0xf0]  ;;  %v64_v25 = vld [vmem:[#allocation2 + $0x30] sm:$0x1]  ;;  %v106_v27 = vunpack.c.l.b16 %v70_v12  ;;  %v908_v30 = vld [vmem:[%s1558_s3 + $0xc0] sm:$0xf]  ;;  %v929_v31 = vor.u32 %v1102_v20, %v926_v21  ;;  %v107_v46 = vunpack.c.l.b16 %v71_v26 }
  0x12   :  { %v110_v28 = vrot.slane %v103_v17, 7  ;;  %v113_v29 = vrot.slane %v104_v18, 6  ;;  %398 = vmatpush.bf16.msra.mxu1 %v925_v22  ;;  %v1100_v32 = vld [vmem:[%s1558_s3 + $0xcc] sm:$0xf0]  ;;  %v1070_v33 = vld [vmem:[#allocation4 + $0x20] sm:$0xff]  ;;  %v933_v36 = vor.u32 %v1105_v24, %v932_v23  ;;  %v72_v40 = vpack.c.bf16 %v64_v25, %v64_v25  ;;  %v1069_v55 = vld [vmem:[#allocation4 + $0x18] sm:$0xff] }
  0x13   :  { %v116_v35 = vrot.slane %v105_v19, 5  ;;  %v1098_v37 = vld [vmem:[%s1558_s3 + $0xc4] sm:$0xf]  ;;  %v910_v38 = vld [vmem:[%s1558_s3 + $0xd0] sm:$0xf0]  ;;  %411 = vmatpush.bf16.msra.mxu2 %v929_v31  ;;  %v909_v42 = vor.u32 %v1100_v32, %v908_v30  ;;  %v119_v47 = vrot.slane %v106_v27, 4 }
  0x14   :  { %v112_v34 = vsel %vm111_vm0, %v110_v28, %v102_v16  ;;  %v65_v39 = vld [vmem:[#allocation2 + $0x38] sm:$0x1]  ;;  %v913_v43 = vor.u32 %v1098_v37, %v910_v38  ;;  %v916_v44 = vld [vmem:[%s1558_s3 + $0xc8] sm:$0xf]  ;;  %424 = vmatpush.bf16.msra.mxu3 %v933_v36  ;;  %v892_v49 = vld [vmem:[%s1558_s3 + $0xa0] sm:$0xf]  ;;  %v108_v59 = vunpack.c.l.b16 %v72_v40 }
  0x15   :  { %183 = vmatpush.bf16.msra.mxu0 %v1071_v15  ;;  %v115_v41 = vsel %vm114_vm1, %v113_v29, %v112_v34  ;;  %v1101_v45 = vld [vmem:[%s1558_s3 + $0xd4] sm:$0xf0]  ;;  %v1096_v50 = vld [vmem:[%s1558_s3 + $0xac] sm:$0xf0]  ;;  %v1094_v52 = vld [vmem:[%s1558_s3 + $0xa4] sm:$0xf]  ;;  %v73_v56 = vpack.c.bf16 %v65_v39, %v65_v39 }
  0x16   :  { %v917_v48 = vor.u32 %v1101_v45, %v916_v44  ;;  %399 = vmatpush.bf16.msra.mxu1 %v909_v42  ;;  %v893_v51 = vor.u32 %v1096_v50, %v892_v49  ;;  %v894_v53 = vld [vmem:[%s1558_s3 + $0xb0] sm:$0xf0]  ;;  %v900_v54 = vld [vmem:[%s1558_s3 + $0xa8] sm:$0xf]  ;;  %v118_v57 = vsel %vm117_vm2, %v116_v35, %v115_v41  ;;  %vm120_vm3 = vcmask 1044484   ;;  %v1066_v27 = vld [vmem:[#allocation4] sm:$0xff] }
  0x17   :  { %v1097_v58 = vld [vmem:[%s1558_s3 + $0xb4] sm:$0xf0]  ;;  %412 = vmatpush.bf16.msra.mxu2 %v913_v43  ;;  %v897_v60 = vor.u32 %v1094_v52, %v894_v53  ;;  %v876_v61 = vld [vmem:[%s1558_s3 + $0x80] sm:$0xf]  ;;  %v1092_v62 = vld [vmem:[%s1558_s3 + $0x8c] sm:$0xf0]  ;;  %v121_v3 = vsel %vm120_vm3, %v119_v47, %v118_v57  ;;  %v109_v8 = vunpack.c.l.b16 %v73_v56 }
  0x18   :  { %v122_v63 = vrot.slane %v107_v46, 3  ;;  %425 = vmatpush.bf16.msra.mxu3 %v917_v48  ;;  %v901_v0 = vor.u32 %v1097_v58, %v900_v54  ;;  %v1090_v1 = vld [vmem:[%s1558_s3 + $0x84] sm:$0xf]  ;;  %v878_v2 = vld [vmem:[%s1558_s3 + $0x90] sm:$0xf0]  ;;  %vm123_vm4 = vcmask 1045509   ;;  %v877_v4 = vor.u32 %v1092_v62, %v876_v61 }
  0x19   :  { %184 = vmatpush.bf16.msra.mxu0 %v1070_v33  ;;  %v884_v5 = vld [vmem:[%s1558_s3 + $0x88] sm:$0xf]  ;;  %v1093_v6 = vld [vmem:[%s1558_s3 + $0x94] sm:$0xf0]  ;;  %v1068_v7 = vld [vmem:[#allocation4 + $0x10] sm:$0xff]  ;;  %v125_v11 = vrot.slane %v108_v59, 2  ;;  %v881_v12 = vor.u32 %v1090_v1, %v878_v2 }
  0x1a   :  { %400 = vmatpush.bf16.msra.mxu1 %v893_v51  ;;  %v860_v9 = vld [vmem:[%s1558_s3 + $0x60] sm:$0xf]  ;;  %v1088_v10 = vld [vmem:[%s1558_s3 + $0x6c] sm:$0xf0]  ;;  %vm126_vm5 = vcmask 1046534   ;;  %v124_v13 = vsel %vm123_vm4, %v122_v63, %v121_v3  ;;  %v885_v14 = vor.u32 %v1093_v6, %v884_v5  ;;  %v1067_v20 = vld [vmem:[#allocation4 + $0x8] sm:$0xff] }
  0x1b   :  { %413 = vmatpush.bf16.msra.mxu2 %v897_v60  ;;  %v1086_v15 = vld [vmem:[%s1558_s3 + $0x64] sm:$0xf]  ;;  %v862_v16 = vld [vmem:[%s1558_s3 + $0x70] sm:$0xf0]  ;;  %v861_v17 = vor.u32 %v1088_v10, %v860_v9  ;;  %v868_v18 = vld [vmem:[%s1558_s3 + $0x68] sm:$0xf]  ;;  %v127_v22 = vsel %vm126_vm5, %v125_v11, %v124_v13 }
  0x1c   :  { %426 = vmatpush.bf16.msra.mxu3 %v901_v0  ;;  %v1089_v19 = vld [vmem:[%s1558_s3 + $0x74] sm:$0xf0]  ;;  %v128_v21 = vrot.slane %v109_v8, 1  ;;  %vm129_vm6 = vcmask 1047559   ;;  %v865_v23 = vor.u32 %v1086_v15, %v862_v16  ;;  %v1103_v24 = vld [vmem:[%s1558_s3 + $0xec] sm:$0xf] }
  0x1d   :  { %185 = vmatpush.bf16.msra.mxu0 %v1069_v55  ;;  %v934_v25 = vld [vmem:[%s1558_s3 + $0xf8] sm:$0xf0]  ;;  %v869_v26 = vor.u32 %v1089_v19, %v868_v18  ;;  %v1099_v30 = vld [vmem:[%s1558_s3 + $0xcc] sm:$0xf]  ;;  %v844_v43 = vld [vmem:[%s1558_s3 + $0x40] sm:$0xf] }
  0x1e   :  { %401 = vmatpush.bf16.msra.mxu1 %v877_v4  ;;  %v130_v28 = vsel %vm129_vm6, %v128_v21, %v127_v22  ;;  %v937_v29 = vor.u32 %v1103_v24, %v934_v25  ;;  %v918_v31 = vld [vmem:[%s1558_s3 + $0xd8] sm:$0xf0]  ;;  %v1095_v34 = vld [vmem:[%s1558_s3 + $0xac] sm:$0xf]  ;;  %v1084_v44 = vld [vmem:[%s1558_s3 + $0x4c] sm:$0xf0] }
  0x1f   :  { %414 = vmatpush.bf16.msra.mxu2 %v881_v12  ;;  %v131_v32 = vpack.c.b16 %v130_v28, %v130_v28  ;;  %v921_v33 = vor.u32 %v1099_v30, %v918_v31  ;;  %v902_v35 = vld [vmem:[%s1558_s3 + $0xb8] sm:$0xf0]  ;;  %v1091_v37 = vld [vmem:[%s1558_s3 + $0x8c] sm:$0xf]  ;;  %v1082_v45 = vld [vmem:[%s1558_s3 + $0x44] sm:$0xf]  ;;  %v845_v46 = vor.u32 %v1084_v44, %v844_v43 }
  0x20   :  { %427 = vmatpush.bf16.msra.mxu3 %v885_v14  ;;  %v905_v36 = vor.u32 %v1095_v34, %v902_v35  ;;  %v886_v38 = vld [vmem:[%s1558_s3 + $0x98] sm:$0xf0]  ;;  %v1087_v40 = vld [vmem:[%s1558_s3 + $0x6c] sm:$0xf]  ;;  %v846_v47 = vld [vmem:[%s1558_s3 + $0x50] sm:$0xf0] }
  0x21   :  { %186 = vmatpush.bf16.msra.mxu0 %v1068_v7  ;;  %v889_v39 = vor.u32 %v1091_v37, %v886_v38  ;;  %v870_v41 = vld [vmem:[%s1558_s3 + $0x78] sm:$0xf0]  ;;  %v852_v48 = vld [vmem:[%s1558_s3 + $0x48] sm:$0xf]  ;;  %v1085_v49 = vld [vmem:[%s1558_s3 + $0x54] sm:$0xf0]  ;;  %v849_v50 = vor.u32 %v1082_v45, %v846_v47 }
  0x22   :  { %402 = vmatpush.bf16.msra.mxu1 %v861_v17  ;;  %v873_v42 = vor.u32 %v1087_v40, %v870_v41  ;;  %v853_v51 = vor.u32 %v1085_v49, %v852_v48  ;;  %v1083_v52 = vld [vmem:[%s1558_s3 + $0x4c] sm:$0xf]  ;;  %v854_v53 = vld [vmem:[%s1558_s3 + $0x58] sm:$0xf0]  ;;  %v828_v55 = vld [vmem:[%s1558_s3 + $0x20] sm:$0xf] }
  0x23   :  { %415 = vmatpush.bf16.msra.mxu2 %v865_v23  ;;  %v857_v54 = vor.u32 %v1083_v52, %v854_v53  ;;  %v1080_v56 = vld [vmem:[%s1558_s3 + $0x2c] sm:$0xf0]  ;;  %v1078_v57 = vld [vmem:[%s1558_s3 + $0x24] sm:$0xf]  ;;  %v830_v59 = vld [vmem:[%s1558_s3 + $0x30] sm:$0xf0] }
  0x24   :  { %428 = vmatpush.bf16.msra.mxu3 %v869_v26  ;;  %v829_v58 = vor.u32 %v1080_v56, %v828_v55  ;;  %v836_v60 = vld [vmem:[%s1558_s3 + $0x28] sm:$0xf]  ;;  %v1081_v61 = vld [vmem:[%s1558_s3 + $0x34] sm:$0xf0]  ;;  %v833_v62 = vor.u32 %v1078_v57, %v830_v59  ;;  %v1079_v0 = vld [vmem:[%s1558_s3 + $0x2c] sm:$0xf] }
  0x25   :  { %187 = vmatpush.bf16.msra.mxu0 %v1067_v20  ;;  %v837_v63 = vor.u32 %v1081_v61, %v836_v60  ;;  %v838_v1 = vld [vmem:[%s1558_s3 + $0x38] sm:$0xf0]  ;;  %v812_v3 = vld [vmem:[%s1558_s3] sm:$0xf]  ;;  %v1076_v4 = vld [vmem:[%s1558_s3 + $0xc] sm:$0xf0] }
  0x26   :  { %403 = vmatpush.bf16.msra.mxu1 %v845_v46  ;;  %v841_v2 = vor.u32 %v1079_v0, %v838_v1  ;;  %v1074_v5 = vld [vmem:[%s1558_s3 + $0x4] sm:$0xf]  ;;  %v813_v6 = vor.u32 %v1076_v4, %v812_v3  ;;  %v814_v7 = vld [vmem:[%s1558_s3 + $0x10] sm:$0xf0]  ;;  %v820_v8 = vld [vmem:[%s1558_s3 + $0x8] sm:$0xf] }
  0x27   :  { %416 = vmatpush.bf16.msra.mxu2 %v849_v50  ;;  %v1077_v9 = vld [vmem:[%s1558_s3 + $0x14] sm:$0xf0]  ;;  %v817_v10 = vor.u32 %v1074_v5, %v814_v7  ;;  %v1075_v12 = vld [vmem:[%s1558_s3 + $0xc] sm:$0xf]  ;;  %v822_v13 = vld [vmem:[%s1558_s3 + $0x18] sm:$0xf0] }
  0x28   :  { %429 = vmatpush.bf16.msra.mxu3 %v853_v51  ;;  %v821_v11 = vor.u32 %v1077_v9, %v820_v8  ;;  %v825_v14 = vor.u32 %v1075_v12, %v822_v13  ;;  %v1113_v15 = vld [vmem:[%s1560_s5 + $0x38] sm:$0xff]  ;;  %v1112_v19 = vld [vmem:[%s1560_s5 + $0x30] sm:$0xff]  ;;  %v1111_v23 = vld [vmem:[%s1560_s5 + $0x28] sm:$0xff]  ;;  %vm770_vm7 = vcmask 31744  }
  0x29   :  { %188 = vmatpush.bf16.msra.mxu0 %v1066_v27  ;;  %v1137_v16 = vld [vmem:[%s1560_s5 + $0xf8] sm:$0xff]  ;;  %v1136_v20 = vld [vmem:[%s1560_s5 + $0xf0] sm:$0xff]  ;;  %v1135_v24 = vld [vmem:[%s1560_s5 + $0xe8] sm:$0xff] }
  0x2a   :  { %404 = vmatpush.bf16.msra.mxu1 %v829_v58  ;;  %v1121_v17 = vld [vmem:[%s1560_s5 + $0x78] sm:$0xff]  ;;  %v1120_v21 = vld [vmem:[%s1560_s5 + $0x70] sm:$0xff]  ;;  %v1119_v25 = vld [vmem:[%s1560_s5 + $0x68] sm:$0xff] }
  0x2b   :  { %417 = vmatpush.bf16.msra.mxu2 %v833_v62  ;;  %v1129_v18 = vld [vmem:[%s1560_s5 + $0xb8] sm:$0xff]  ;;  %v1128_v22 = vld [vmem:[%s1560_s5 + $0xb0] sm:$0xff]  ;;  %v1127_v26 = vld [vmem:[%s1560_s5 + $0xa8] sm:$0xff] }
  0x2c   :  { %189 = vmatmul.bf16.vlgmr.msra.gmra.mxu0 %v131_v32  ;;  %430 = vmatpush.bf16.msra.mxu3 %v837_v63  ;;  %v1110_v27 = vld [vmem:[%s1560_s5 + $0x20] sm:$0xff]  ;;  %v1109_v31 = vld [vmem:[%s1560_s5 + $0x18] sm:$0xff]  ;;  %v1132_v37 = vld [vmem:[%s1560_s5 + $0xd0] sm:$0xff] }
  0x2d   :  { %437 = vmatpush.bf16.msrb.mxu0 %v937_v29  ;;  %v1134_v28 = vld [vmem:[%s1560_s5 + $0xe0] sm:$0xff]  ;;  %v1133_v32 = vld [vmem:[%s1560_s5 + $0xd8] sm:$0xff]  ;;  %v1107_v43 = vld [vmem:[%s1560_s5 + $0x8] sm:$0xff] }
  0x2e   :  { %405 = vmatpush.bf16.msra.mxu1 %v813_v6  ;;  %v1118_v29 = vld [vmem:[%s1560_s5 + $0x60] sm:$0xff]  ;;  %v1125_v34 = vld [vmem:[%s1560_s5 + $0x98] sm:$0xff]  ;;  %v1131_v44 = vld [vmem:[%s1560_s5 + $0xc8] sm:$0xff] }
  0x2f   :  { %418 = vmatpush.bf16.msra.mxu2 %v817_v10  ;;  %v1126_v30 = vld [vmem:[%s1560_s5 + $0xa0] sm:$0xff]  ;;  %v1116_v45 = vld [vmem:[%s1560_s5 + $0x50] sm:$0xff]  ;;  %v1115_v49 = vld [vmem:[%s1560_s5 + $0x48] sm:$0xff] }
  0x30   :  { %431 = vmatpush.bf16.msra.mxu3 %v821_v11  ;;  %v1144_v35 = vld [vmem:[%s1557_s2] ss:$0 sm:$0xff]  ;;  %v1124_v46 = vld [vmem:[%s1560_s5 + $0x90] sm:$0xff]  ;;  %v1123_v50 = vld [vmem:[%s1560_s5 + $0x88] sm:$0xff] }
  0x31   :  { %438 = vmatpush.bf16.msrb.mxu0 %v921_v33  ;;  %v1117_v33 = vld [vmem:[%s1560_s5 + $0x58] sm:$0xff]  ;;  %v1106_v47 = vld [vmem:[%s1560_s5] sm:$0xff] }
  0x32   :  { %718 = vmatpush.bf16.msrb.mxu1 %v1113_v15  ;;  %v1130_v48 = vld [vmem:[%s1560_s5 + $0xc0] sm:$0xff] }
  0x33   :  { %731 = vmatpush.bf16.msrb.mxu2 %v1121_v17  ;;  %v1114_v51 = vld [vmem:[%s1560_s5 + $0x40] sm:$0xff] }
  0x34   :  { %744 = vmatpush.bf16.msrb.mxu3 %v1129_v18  ;;  %v1122_v52 = vld [vmem:[%s1560_s5 + $0x80] sm:$0xff] }
  0x35   :  { %439 = vmatpush.bf16.msrb.mxu0 %v905_v36  ;;  %v1108_v36 = vld [vmem:[%s1560_s5 + $0x10] sm:$0xff]  ;;  %v228_v53 = vld [vmem:[%s1559_s4] sm:$0xf] }
  0x36   :  { %719 = vmatpush.bf16.msrb.mxu1 %v1112_v19  ;;  %v233_v55 = vperm.slane %v228_v53, 3  ;;  %v231_v61 = vperm.slane %v228_v53, 1  ;;  %v232_v63 = vperm.slane %v228_v53, 2 }
  0x37   :  { %732 = vmatpush.bf16.msrb.mxu2 %v1120_v21 }
  0x38   :  { %745 = vmatpush.bf16.msrb.mxu3 %v1128_v22 }
  0x39   :  { %440 = vmatpush.bf16.msrb.mxu0 %v889_v39 }
  0x3a   :  { %720 = vmatpush.bf16.msrb.mxu1 %v1111_v23 }
  0x3b   :  { %733 = vmatpush.bf16.msrb.mxu2 %v1119_v25 }
  0x3c   :  { %746 = vmatpush.bf16.msrb.mxu3 %v1127_v26 }
  0x3d   :  { %441 = vmatpush.bf16.msrb.mxu0 %v873_v42 }
  0x3e   :  { %721 = vmatpush.bf16.msrb.mxu1 %v1110_v27 }
  0x3f   :  { %734 = vmatpush.bf16.msrb.mxu2 %v1118_v29 }
  0x40   :  { %747 = vmatpush.bf16.msrb.mxu3 %v1126_v30 }
  0x41   :  { %442 = vmatpush.bf16.msrb.mxu0 %v857_v54  ;;  %v230_v54 = vperm.slane %v228_v53, 0 }
  0x42   :  { %722 = vmatpush.bf16.msrb.mxu1 %v1109_v31 }
  0x43   :  { %735 = vmatpush.bf16.msrb.mxu2 %v1117_v33 }
  0x44   :  { %748 = vmatpush.bf16.msrb.mxu3 %v1125_v34 }
  0x45   :  { %443 = vmatpush.bf16.msrb.mxu0 %v841_v2 }
  0x46   :  { %723 = vmatpush.bf16.msrb.mxu1 %v1108_v36 }
  0x47   :  { %736 = vmatpush.bf16.msrb.mxu2 %v1116_v45 }
  0x48   :  { %749 = vmatpush.bf16.msrb.mxu3 %v1124_v46 }
  0x49   :  { %444 = vmatpush.bf16.msrb.mxu0 %v825_v14 }
  0x4a   :  { %724 = vmatpush.bf16.msrb.mxu1 %v1107_v43 }
  0x4b   :  { %737 = vmatpush.bf16.msrb.mxu2 %v1115_v49 }
  0x4c   :  { %750 = vmatpush.bf16.msrb.mxu3 %v1123_v50 }
  0x4d   :  { %757 = vmatpush.bf16.msra.mxu0 %v1137_v16  ;;  %v1145_v16 = vld [vmem:[%s1561_s6] ss:$0 sm:$0xff] }
  0x4e   :  { %725 = vmatpush.bf16.msrb.mxu1 %v1106_v47 }
  0x4f   :  { %738 = vmatpush.bf16.msrb.mxu2 %v1114_v51 }
  0x50   :  { %751 = vmatpush.bf16.msrb.mxu3 %v1122_v52 }
  0x51   :  { %758 = vmatpush.bf16.msra.mxu0 %v1136_v20 }
  0x55   :  { %759 = vmatpush.bf16.msra.mxu0 %v1135_v24 }
  0x59   :  { %760 = vmatpush.bf16.msra.mxu0 %v1134_v28 }
  0x5d   :  { %761 = vmatpush.bf16.msra.mxu0 %v1133_v32 }
  0x61   :  { %762 = vmatpush.bf16.msra.mxu0 %v1132_v37 }
  0x65   :  { %763 = vmatpush.bf16.msra.mxu0 %v1131_v44 }
  0x69   :  { %764 = vmatpush.bf16.msra.mxu0 %v1130_v48 }
  0xa9   :  { %v190_v38 = vpop.f32.mrf.mxu0 }
  0xaa   :  { %v191_v39 = vadd.f32 %v1144_v35, %v190_v38 }
  0xac   :  { %1146 = vtanh.f32 %v191_v39 }
  0xb1   :  { %v192_v40 = vpop.f32.mrf.mxu0 }
  0xb2   :  { %v1147_v41 = vpop.eup %1146 }
  0xb3   :  { %v195_v42 = vpack.c.bf16 %v1147_v41, %v1147_v41 }
  0xb5   :  { %406 = vmatmul.bf16.vlgmr.msra.gmra.mxu1 %v195_v42  ;;  %419 = vmatmul.bf16.vlgmr.msra.gmra.mxu2 %v195_v42 }
  0xb6   :  { %432 = vmatmul.bf16.vlgmr.msra.gmra.mxu3 %v195_v42  ;;  %445 = vmatmul.bf16.vlgmr.msrb.gmra.mxu0 %v195_v42 }
 0x132   :  { %v407_v56 = vpop.f32.mrf.mxu1 }
 0x133   :  { %v408_v57 = vadd.f32 %v407_v56, %v230_v54  ;;  %v446_v58 = vpop.f32.mrf.mxu0 }
 0x134   :  { %v447_v59 = vadd.f32 %v446_v58, %v233_v55 }
 0x135   :  { %v450_v60 = vmax.f32 %v408_v57, 0.0 }
 0x136   :  { %v453_v62 = vmax.f32 %v447_v59, 0.0 }
 0x137   :  { %v454_v0 = vpack.c.bf16 %v450_v60, %v450_v60 }
 0x138   :  { %v457_v1 = vpack.c.bf16 %v453_v62, %v453_v62  ;;  %v420_v2 = vpop.f32.mrf.mxu2 }
 0x139   :  { %v421_v3 = vadd.f32 %v420_v2, %v231_v61  ;;  %v433_v4 = vpop.f32.mrf.mxu3  ;;  %726 = vmatmul.bf16.vlgmr.msrb.gmra.mxu1 %v454_v0 }
 0x13a   :  { %v434_v5 = vadd.f32 %v433_v4, %v232_v63  ;;  %765 = vmatmul.bf16.vlgmr.msra.gmra.mxu0 %v457_v1  ;;  %v409_v6 = vpop.f32.mrf.mxu1 }
 0x13b   :  { %v451_v7 = vmax.f32 %v421_v3, 0.0  ;;  %v448_v8 = vpop.f32.mrf.mxu0 }
 0x13c   :  { %v452_v9 = vmax.f32 %v434_v5, 0.0 }
 0x13d   :  { %v455_v10 = vpack.c.bf16 %v451_v7, %v451_v7 }
 0x13e   :  { %v456_v11 = vpack.c.bf16 %v452_v9, %v452_v9 }
 0x13f   :  { %739 = vmatmul.bf16.vlgmr.msrb.gmra.mxu2 %v455_v10 }
 0x140   :  { %752 = vmatmul.bf16.vlgmr.msrb.gmra.mxu3 %v456_v11  ;;  %v422_v12 = vpop.f32.mrf.mxu2 }
 0x141   :  { %v435_v13 = vpop.f32.mrf.mxu3 }
 0x1b6   :  { %v727_v14 = vpop.f32.mrf.mxu1 }
 0x1b7   :  { %v766_v15 = vpop.f32.mrf.mxu0  ;;  %v728_v19 = vadd.f32 %v1145_v16, %v727_v14 }
 0x1be   :  { %v729_v17 = vpop.f32.mrf.mxu1 }
 0x1bf   :  { %v768_v18 = vpop.f32.mrf.mxu0 }
 0x1c2   :  { %v740_v20 = vpop.f32.mrf.mxu2 }
 0x1c3   :  { %v741_v21 = vadd.f32 %v740_v20, %v728_v19  ;;  %v753_v22 = vpop.f32.mrf.mxu3 }
 0x1c5   :  { %v754_v23 = vadd.f32 %v753_v22, %v741_v21 }
 0x1c7   :  { %v767_v24 = vadd.f32 %v766_v15, %v754_v23 }
 0x1c9   :  { %771 = vst.msk [vmem:[%s1562_s7] sm:$0xff] %vm770_vm7, %v767_v24 }
 0x1ca   :  { %v742_v25 = vpop.f32.mrf.mxu2 }
 0x1cb   :  { %v755_v26 = vpop.f32.mrf.mxu3 }
 0x1cc   :  { %776 = vsyncpa [#allocation3], 1 }
 0x1cd   :  { %777 = vsyncpa [#allocation5], 1 }

</bundles_post_ra>
